<compile_context>
chip_gen: v6e
topology: v6e:2x2x1
jax: 0.10.0
libtpu: 0.0.40
codegen_flags: <defaults>
</compile_context>

<pallas_src>
import functools

import jax
import jax.numpy as jnp
from jax.experimental import pallas as pl
from jax.experimental.pallas import tpu as pltpu

LANE = 128  # TPU lane width; pad the class axis to a multiple of this.


def _mlp_softmax_kernel(x_ref, w1_ref, b1_ref, w2_ref, b2_ref, w3_ref, b3_ref,
                        o_ref):
    """One batch tile of softmax(relu(relu(x@W1+b1)@W2+b2)@W3+b3).

    Weights arrive pre-transposed to (in, out); x arrives f32 and is cast to
    bf16 in-register (fused cast).  All accumulation / elementwise math is f32.
    """
    x = x_ref[...].astype(jnp.bfloat16)                          # (TB, F)

    # Layer 1: Linear + ReLU  (bf16 MXU operands, f32 accumulation)
    h = jnp.dot(x, w1_ref[...],
                preferred_element_type=jnp.float32) + b1_ref[...]
    h = jnp.maximum(h, 0.0).astype(jnp.bfloat16)                 # (TB, H0)

    # Layer 2: Linear + ReLU
    h = jnp.dot(h, w2_ref[...],
                preferred_element_type=jnp.float32) + b2_ref[...]
    h = jnp.maximum(h, 0.0).astype(jnp.bfloat16)                 # (TB, H1)

    # Layer 3: Linear -> lane-dense padded logits (padded classes carry a
    # -1e30 f32 bias so exp() underflows to exactly 0).
    logits = jnp.dot(h, w3_ref[...],
                     preferred_element_type=jnp.float32) + b3_ref[...]

    # Numerically-stable softmax over the (padded) class axis, in f32.
    # Exact division so every row sums to 1 within f32 rounding.
    m = jnp.max(logits, axis=-1, keepdims=True)
    e = jnp.exp(logits - m)
    s = jnp.sum(e, axis=-1, keepdims=True)
    o_ref[...] = e / s


def prepare_params(params):
    """One-time parameter prep (do this when the model is built, NOT per call).

    Casts weights to bf16, transposes them to (in, out) layout, pads the final
    layer's class axis to a multiple of 128 lanes (zero weight columns,
    -1e30 f32 bias), and reshapes biases to (1, N) rows.
    """
    w1, b1 = params["w1"], params["b1"]
    w2, b2 = params["w2"], params["b2"]
    w3, b3 = params["w3"], params["b3"]

    C, H1 = w3.shape
    Cp = ((C + LANE - 1) // LANE) * LANE

    prepared = {
        "w1": jnp.asarray(w1.T, jnp.bfloat16),                     # (F, H0)
        "b1": jnp.asarray(b1, jnp.float32).reshape(1, -1),         # (1, H0)
        "w2": jnp.asarray(w2.T, jnp.bfloat16),                     # (H0, H1)
        "b2": jnp.asarray(b2, jnp.float32).reshape(1, -1),         # (1, H1)
        # Padded classes: zero columns + -1e30 bias (keep the bias in f32!).
        "w3": jnp.zeros((H1, Cp), jnp.bfloat16)
                 .at[:, :C].set(jnp.asarray(w3.T, jnp.bfloat16)),  # (H1, Cp)
        "b3": jnp.full((1, Cp), -1e30, jnp.float32)
                 .at[0, :C].set(jnp.asarray(b3, jnp.float32)),     # (1, Cp)
    }
    return jax.tree_util.tree_map(jax.block_until_ready,
                                  jax.device_put(prepared))


@functools.partial(jax.jit, static_argnames=("tb",))
def neuralnet_forward_padded(x, prepared, *, tb=256):
    """x: (B, F) f32; prepared: output of prepare_params().

    Returns the lane-dense padded (B, Cp) f32 softmax slab; columns >= C are
    exactly 0 -- slice or ignore them lazily downstream.

    Batch-tile guidance:
      * v6e/v7x large batches: tb=256-512 (multiple of 16).
      * v7x: pick tb so B//tb >= 2 so both TensorCores get tiles.
      * v5e: cap tb at 128-256.
      * tiny batches (demo): tb=B -> grid=(1,), no per-step overhead.
    """
    B, F = x.shape
    H0 = prepared["w1"].shape[1]
    H1 = prepared["w2"].shape[1]
    Cp = prepared["w3"].shape[1]

    # Batch tile: multiple of 16 (bf16 sublane packing) or the whole batch.
    tb = min(tb, B)
    assert B % tb == 0 and (tb % 16 == 0 or tb == B), (B, tb)
    grid = (B // tb,)

    resident = lambda i: (0, 0)   # weights/biases resident across batch tiles

    return pl.pallas_call(
        _mlp_softmax_kernel,
        out_shape=jax.ShapeDtypeStruct((B, Cp), jnp.float32),
        grid_spec=pl.GridSpec(
            grid=grid,
            in_specs=[
                pl.BlockSpec((tb, F), lambda i: (i, 0)),   # x: tiled over batch
                pl.BlockSpec((F, H0), resident),           # W1 (in, out)
                pl.BlockSpec((1, H0), resident),           # b1
                pl.BlockSpec((H0, H1), resident),          # W2
                pl.BlockSpec((1, H1), resident),           # b2
                pl.BlockSpec((H1, Cp), resident),          # W3 (class-padded)
                pl.BlockSpec((1, Cp), resident),           # b3 (class-padded)
            ],
            out_specs=pl.BlockSpec((tb, Cp), lambda i: (i, 0)),
        ),
        compiler_params=pltpu.CompilerParams(
            # Independent batch tiles -> megacore / dual-TC sharding on v7x.
            dimension_semantics=("parallel",),
            # Plenty of headroom on every generation (<= v7x 64 MiB physical).
            vmem_limit_bytes=32 * 1024 * 1024,
        ),
    )(x, prepared["w1"], prepared["b1"], prepared["w2"], prepared["b2"],
      prepared["w3"], prepared["b3"])


if __name__ == "__main__":
    key = jax.random.PRNGKey(0)
    keys = jax.random.split(key, 7)

    batch = 32
    num_features = 32
    shape_hidden = (64, 32)
    num_classes = 10

    def linear_init(kw, kb, out_f, in_f):
        # Mimics nn.Linear's uniform(-1/sqrt(in_f), 1/sqrt(in_f)) init.
        bound = 1.0 / jnp.sqrt(jnp.float32(in_f))
        w = jax.random.uniform(kw, (out_f, in_f), minval=-bound, maxval=bound,
                               dtype=jnp.float32)
        b = jax.random.uniform(kb, (out_f,), minval=-bound, maxval=bound,
                               dtype=jnp.float32)
        return w, b

    x = jax.random.normal(keys[0], (batch, num_features), dtype=jnp.float32)
    w1, b1 = linear_init(keys[1], keys[2], shape_hidden[0], num_features)
    w2, b2 = linear_init(keys[3], keys[4], shape_hidden[1], shape_hidden[0])
    w3, b3 = linear_init(keys[5], keys[6], num_classes, shape_hidden[1])
    params = dict(w1=w1, b1=b1, w2=w2, b2=b2, w3=w3, b3=b3)

    # One-time weight prep (done at model-build time, not per forward call).
    prepared = prepare_params(params)

    # Demo config B=32: tb=32 -> grid=(1,), single pipeline step.
    out_padded = neuralnet_forward_padded(x, prepared, tb=32)
    out_padded = jax.block_until_ready(out_padded)

    # Consumer-side lazy slice of the padded class axis (outside the kernel).
    out = out_padded[:, :num_classes]

    # Pure-JAX f32 reference (matches the PyTorch module's forward;
    # nn.Softmax() with no dim resolves to dim=1 for 2-D input).
    h = jnp.maximum(x @ w1.T + b1, 0.0)
    h = jnp.maximum(h @ w2.T + b2, 0.0)
    ref = jax.nn.softmax(h @ w3.T + b3, axis=-1)

    assert out.shape == (batch, num_classes)
    # bf16 MXU operands -> relaxed tolerance vs the f32 reference.
    assert jnp.allclose(out, ref, atol=5e-3, rtol=5e-2), float(
        jnp.max(jnp.abs(out - ref)))
    # Exact divide in the kernel: rows sum to 1 within f32 rounding, and the
    # padded classes contribute exactly 0.
    assert jnp.allclose(jnp.sum(out_padded, axis=-1), 1.0, atol=1e-4)
    assert jnp.all(out_padded[:, num_classes:] == 0.0)

    print("KERNEL_OK")
</pallas_src>

<mosaic_0001>
module attributes {stable_mosaic.version = 11 : i64} {
  func.func @_mlp_softmax_kernel(%arg0: i32, %arg1: memref<32x32xf32, #tpu.memory_space<vmem>>, %arg2: memref<32x64xbf16, #tpu.memory_space<vmem>>, %arg3: memref<1x64xf32, #tpu.memory_space<vmem>>, %arg4: memref<64x32xbf16, #tpu.memory_space<vmem>>, %arg5: memref<1x32xf32, #tpu.memory_space<vmem>>, %arg6: memref<32x128xbf16, #tpu.memory_space<vmem>>, %arg7: memref<1x128xf32, #tpu.memory_space<vmem>>, %arg8: memref<32x128xf32, #tpu.memory_space<vmem>>) attributes {dimension_semantics = [#tpu.dimension_semantics<parallel>], iteration_bounds = array<i64: 1>, scalar_prefetch = 0 : i64, scratch_operands = 0 : i64, tpu.core_type = #tpu.core_type<tc>, window_params = [{transform_indices = @transform_0, window_bounds = array<i64: 32, 32>}, {pipeline_mode = #tpu.pipeline_mode<synchronous>, transform_indices = @transform_1, window_bounds = array<i64: 32, 64>}, {pipeline_mode = #tpu.pipeline_mode<synchronous>, transform_indices = @transform_2, window_bounds = array<i64: 1, 64>}, {pipeline_mode = #tpu.pipeline_mode<synchronous>, transform_indices = @transform_3, window_bounds = array<i64: 64, 32>}, {pipeline_mode = #tpu.pipeline_mode<synchronous>, transform_indices = @transform_4, window_bounds = array<i64: 1, 32>}, {pipeline_mode = #tpu.pipeline_mode<synchronous>, transform_indices = @transform_5, window_bounds = array<i64: 32, 128>}, {pipeline_mode = #tpu.pipeline_mode<synchronous>, transform_indices = @transform_6, window_bounds = array<i64: 1, 128>}, {transform_indices = @transform_7, window_bounds = array<i64: 32, 128>}]} {
    %c0 = arith.constant 0 : index
    %c0_0 = arith.constant 0 : index
    %0 = vector.load %arg1[%c0, %c0_0] : memref<32x32xf32, #tpu.memory_space<vmem>>, vector<32x32xf32>
    %1 = arith.truncf %0 : vector<32x32xf32> to vector<32x32xbf16>
    %c0_1 = arith.constant 0 : index
    %c0_2 = arith.constant 0 : index
    %2 = vector.load %arg2[%c0_1, %c0_2] : memref<32x64xbf16, #tpu.memory_space<vmem>>, vector<32x64xbf16>
    %cst = arith.constant dense<0.000000e+00> : vector<32x64xf32>
    %3 = tpu.matmul %1, %2, %cst {dimension_numbers = #tpu.dot_dimension_numbers<[1], [0], [0], [1], [0, 0, 1, 1], [], []>} : vector<32x32xbf16>, vector<32x64xbf16>, vector<32x64xf32> -> vector<32x64xf32>
    %c0_3 = arith.constant 0 : index
    %c0_4 = arith.constant 0 : index
    %4 = vector.load %arg3[%c0_3, %c0_4] : memref<1x64xf32, #tpu.memory_space<vmem>>, vector<1x64xf32>
    %5 = vector.broadcast %4 : vector<1x64xf32> to vector<32x64xf32>
    %6 = arith.addf %3, %5 : vector<32x64xf32>
    %cst_5 = arith.constant 0.000000e+00 : f32
    %7 = vector.broadcast %cst_5 : f32 to vector<32x64xf32>
    %8 = arith.maximumf %6, %7 : vector<32x64xf32>
    %9 = arith.truncf %8 : vector<32x64xf32> to vector<32x64xbf16>
    %c0_6 = arith.constant 0 : index
    %c0_7 = arith.constant 0 : index
    %10 = vector.load %arg4[%c0_6, %c0_7] : memref<64x32xbf16, #tpu.memory_space<vmem>>, vector<64x32xbf16>
    %cst_8 = arith.constant dense<0.000000e+00> : vector<32x32xf32>
    %11 = tpu.matmul %9, %10, %cst_8 {dimension_numbers = #tpu.dot_dimension_numbers<[1], [0], [0], [1], [0, 0, 1, 1], [], []>} : vector<32x64xbf16>, vector<64x32xbf16>, vector<32x32xf32> -> vector<32x32xf32>
    %c0_9 = arith.constant 0 : index
    %c0_10 = arith.constant 0 : index
    %12 = vector.load %arg5[%c0_9, %c0_10] : memref<1x32xf32, #tpu.memory_space<vmem>>, vector<1x32xf32>
    %13 = vector.broadcast %12 : vector<1x32xf32> to vector<32x32xf32>
    %14 = arith.addf %11, %13 : vector<32x32xf32>
    %cst_11 = arith.constant 0.000000e+00 : f32
    %15 = vector.broadcast %cst_11 : f32 to vector<32x32xf32>
    %16 = arith.maximumf %14, %15 : vector<32x32xf32>
    %17 = arith.truncf %16 : vector<32x32xf32> to vector<32x32xbf16>
    %c0_12 = arith.constant 0 : index
    %c0_13 = arith.constant 0 : index
    %18 = vector.load %arg6[%c0_12, %c0_13] : memref<32x128xbf16, #tpu.memory_space<vmem>>, vector<32x128xbf16>
    %cst_14 = arith.constant dense<0.000000e+00> : vector<32x128xf32>
    %19 = tpu.matmul %17, %18, %cst_14 {dimension_numbers = #tpu.dot_dimension_numbers<[1], [0], [0], [1], [0, 0, 1, 1], [], []>} : vector<32x32xbf16>, vector<32x128xbf16>, vector<32x128xf32> -> vector<32x128xf32>
    %c0_15 = arith.constant 0 : index
    %c0_16 = arith.constant 0 : index
    %20 = vector.load %arg7[%c0_15, %c0_16] : memref<1x128xf32, #tpu.memory_space<vmem>>, vector<1x128xf32>
    %21 = vector.broadcast %20 : vector<1x128xf32> to vector<32x128xf32>
    %22 = arith.addf %19, %21 : vector<32x128xf32>
    %cst_17 = arith.constant dense<0xFF800000> : vector<32xf32>
    %23 = vector.multi_reduction <maximumf>, %22, %cst_17 [1] : vector<32x128xf32> to vector<32xf32>
    %24 = vector.shape_cast %23 : vector<32xf32> to vector<32x1xf32>
    %25 = vector.broadcast %24 : vector<32x1xf32> to vector<32x128xf32>
    %26 = arith.subf %22, %25 : vector<32x128xf32>
    %27 = math.exp %26 : vector<32x128xf32>
    %cst_18 = arith.constant dense<0.000000e+00> : vector<32xf32>
    %28 = vector.multi_reduction <add>, %27, %cst_18 [1] : vector<32x128xf32> to vector<32xf32>
    %29 = vector.shape_cast %28 : vector<32xf32> to vector<32x1xf32>
    %30 = vector.broadcast %29 : vector<32x1xf32> to vector<32x128xf32>
    %31 = arith.divf %27, %30 : vector<32x128xf32>
    %c0_19 = arith.constant 0 : index
    %c0_20 = arith.constant 0 : index
    %32 = vector.load %arg8[%c0_19, %c0_20] : memref<32x128xf32, #tpu.memory_space<vmem>>, vector<32x128xf32>
    tpu.vector_store %arg8[%c0_19, %c0_20], %31 {strides = array<i32>} : memref<32x128xf32, #tpu.memory_space<vmem>>, vector<32x128xf32>,
    return
  }
  func.func @transform_0(%arg0: i32) -> (i32, i32) {
    %c0_i32 = arith.constant 0 : i32
    %c0_i32_0 = arith.constant 0 : i32
    return %arg0, %c0_i32 : i32, i32
  }
  func.func @transform_1(%arg0: i32) -> (i32, i32) {
    %c0_i32 = arith.constant 0 : i32
    %c0_i32_0 = arith.constant 0 : i32
    %c0_i32_1 = arith.constant 0 : i32
    return %c0_i32, %c0_i32_0 : i32, i32
  }
  func.func @transform_2(%arg0: i32) -> (i32, i32) {
    %c0_i32 = arith.constant 0 : i32
    %c0_i32_0 = arith.constant 0 : i32
    %c0_i32_1 = arith.constant 0 : i32
    return %c0_i32, %c0_i32_0 : i32, i32
  }
  func.func @transform_3(%arg0: i32) -> (i32, i32) {
    %c0_i32 = arith.constant 0 : i32
    %c0_i32_0 = arith.constant 0 : i32
    %c0_i32_1 = arith.constant 0 : i32
    return %c0_i32, %c0_i32_0 : i32, i32
  }
  func.func @transform_4(%arg0: i32) -> (i32, i32) {
    %c0_i32 = arith.constant 0 : i32
    %c0_i32_0 = arith.constant 0 : i32
    %c0_i32_1 = arith.constant 0 : i32
    return %c0_i32, %c0_i32_0 : i32, i32
  }
  func.func @transform_5(%arg0: i32) -> (i32, i32) {
    %c0_i32 = arith.constant 0 : i32
    %c0_i32_0 = arith.constant 0 : i32
    %c0_i32_1 = arith.constant 0 : i32
    return %c0_i32, %c0_i32_0 : i32, i32
  }
  func.func @transform_6(%arg0: i32) -> (i32, i32) {
    %c0_i32 = arith.constant 0 : i32
    %c0_i32_0 = arith.constant 0 : i32
    %c0_i32_1 = arith.constant 0 : i32
    return %c0_i32, %c0_i32_0 : i32, i32
  }
  func.func @transform_7(%arg0: i32) -> (i32, i32) {
    %c0_i32 = arith.constant 0 : i32
    %c0_i32_0 = arith.constant 0 : i32
    return %arg0, %c0_i32 : i32, i32
  }
}

</mosaic_0001>

<bundles_post_ra>
// kernel: neuralnet_forward_padded.1
= control target key start
LH: loop header
LB: loop body
LE: loop exit
PB: predicated region body
PF: predicated region fallthrough
CT: control target
= control target key end

     0   :  { %12 = vsyncpa [#allocation3], 0  ;;  %s597_s0 = inlined_call_operand.vmem [shape: f32[32,32], index: 0, kind: input, shape index: {}]   ;;  %s598_s1 = inlined_call_operand.vmem [shape: bf16[32,64], index: 1, kind: input, shape index: {}]   ;;  %s599_s2 = inlined_call_operand.vmem [shape: f32[1,64], index: 2, kind: input, shape index: {}]   ;;  %s600_s3 = inlined_call_operand.vmem [shape: bf16[64,32], index: 3, kind: input, shape index: {}]   ;;  %s601_s4 = inlined_call_operand.vmem [shape: f32[1,32], index: 4, kind: input, shape index: {}]   ;;  %s602_s5 = inlined_call_operand.hbm [shape: bf16[32,128], index: 5, kind: input, shape index: {}]   ;;  %s603_s6 = inlined_call_operand.vmem [shape: f32[1,128], index: 6, kind: input, shape index: {}]   ;;  %s604_s7 = inlined_call_operand.hbm [shape: f32[32,128], index: 7, kind: output, shape index: {}]  }
   0x1   :  { %13 = vsyncpa [#allocation4], 0  ;;  %s502_s24 = smov [#allocation2]  }
   0x2   :  { %s29_s25 = sshll.u32 %s502_s24, 4  ;;  %s30_s25 = int_to_ptr.vmem [resolvable:$true] %s29_s25 }
   0x3   :  { %s466_s26 = scalar_lea.vmem %s30_s25, 256  ;;  %p471_p1 = scmp.lt.s32.totalorder %s30_s25, %s30_s25 }
   0x4   :  { %p467_p0 = scmp.ne.s32.totalorder %s30_s25, %s466_s26  ;;  %p472_p2 = scmp.lt.s32.totalorder %s466_s26, %s466_s26 }
   0x6   :  { %p473_p3 = por %p472_p2, %p471_p1 }
   0x8   :  { %p474_p4 = pnand %p473_p3, %p467_p0 }
   0xa   :  { %477 = shalt.err (!%p474_p4)
}
   0xb   :  { %s503_s27 = smov 64   ;;  %s504_s28 = smov 4  }
   0xc   :  { %35 = dma.hbm_to_vmem [thread:$0]  %s602_s5, 256, %s30_s25, [#allocation3], %s503_s27, %s503_s27, %s504_s28  }
   0xd   :  { %498 = dma.done.wait [#allocation3], 256  }
   0xe   :  { %499 = vsyncadd [#allocation3], 4294967040  ;;  %v434_v0 = vld [vmem:[%s598_s1 + $0x8] sm:$0xff]   ;;  %v435_v1 = vld [vmem:[%s598_s1] sm:$0xff]   ;;  %vm71_vm0 = vcmask 261120   ;;  %vm172_vm1 = vcmask 523264  }
   0xf   :  { %400 = vmatprep.subr.bf16.mxu0 %v434_v0  ;;  %v42_v2 = vld [vmem:[%s597_s0] sm:$0xff]  ;;  %v43_v3 = vld [vmem:[%s597_s0 + $0x8] sm:$0xff]  ;;  %v44_v4 = vld [vmem:[%s597_s0 + $0x10] sm:$0xff] }
  0x10   :  { %401 = vmatpush3.bf16.msra.mxu0 %v434_v0  ;;  %v46_v5 = vpack.c.bf16 %v43_v3, %v42_v2  ;;  %v45_v6 = vld [vmem:[%s597_s0 + $0x18] sm:$0xff]  ;;  %v437_v9 = vld [vmem:[%s600_s3 + $0x10] sm:$0xff]   ;;  %v438_v10 = vld [vmem:[%s600_s3 + $0x8] sm:$0xff]  }
  0x11   :  { %402 = vmatprep.subr.bf16.mxu0 %v435_v1  ;;  %v436_v7 = vld [vmem:[%s600_s3 + $0x18] sm:$0xff]   ;;  %v47_v8 = vpack.c.bf16 %v45_v6, %v44_v4  ;;  %v439_v11 = vld [vmem:[%s600_s3] sm:$0xff]   ;;  %v440_v27 = vld [vmem:[#allocation2 + $0x8] sm:$0xff]  }
  0x12   :  { %404 = vmatprep.mubr.msk.bf16.mxu0 %vm71_vm0, %v46_v5  ;;  %408 = vmatprep.subr.bf16.mxu1 %v436_v7  ;;  %v369_v14 = vld [vmem:[%s599_s2] ss:$0 sm:$0xff] }
  0x13   :  { %409 = vmatpush3.bf16.msra.mxu1 %v436_v7  ;;  %v441_v28 = vld [vmem:[#allocation2] sm:$0xff]  }
  0x14   :  { %403 = vmatpush3.bf16.msra.mxu0 %v435_v1  ;;  %410 = vmatprep.subr.bf16.mxu1 %v437_v9  ;;  %v374_v31 = vld [vmem:[%s601_s4] ss:$0 sm:$0xff]  ;;  %s505_s4 = smov [#allocation5]  }
  0x15   :  { %420 = vmatprep.subr.bf16.mxu0 %v440_v27  ;;  %v381_v44 = vld [vmem:[%s603_s6] ss:$0 sm:$0xff]  ;;  %s357_s6 = sshll.u32 %s505_s4, 4  ;;  %s358_s6 = int_to_ptr.vmem [resolvable:$true] %s357_s6 }
  0x16   :  { %s478_s29 = scalar_lea.vmem %s358_s6, 512  ;;  %p483_p6 = scmp.lt.s32.totalorder %s358_s6, %s358_s6 }
  0x17   :  { %405 = vmatmul.mubr.msk.bf16.vlgmr.msra.gmra.mxu0 %vm71_vm0, %v47_v8  ;;  %411 = vmatpush3.bf16.msra.mxu1 %v437_v9  ;;  %p479_p5 = scmp.ne.s32.totalorder %s358_s6, %s478_s29  ;;  %p484_p7 = scmp.lt.s32.totalorder %s478_s29, %s478_s29 }
  0x18   :  { %412 = vmatprep.subr.bf16.mxu1 %v438_v10  ;;  %421 = vmatpush3.bf16.msra.mxu0 %v440_v27 }
  0x19   :  { %422 = vmatprep.subr.bf16.mxu0 %v441_v28  ;;  %p485_p8 = por %p484_p7, %p483_p6 }
  0x1b   :  { %413 = vmatpush3.bf16.msra.mxu1 %v438_v10  ;;  %p486_p9 = pnand %p485_p8, %p479_p5 }
  0x1c   :  { %414 = vmatprep.subr.bf16.mxu1 %v439_v11  ;;  %423 = vmatpush3.bf16.msra.mxu0 %v441_v28 }
  0x1f   :  { %415 = vmatpush3.bf16.msra.mxu1 %v439_v11 }
  0xd7   :  { %v406_v12 = vpop.f32.mrf.mxu0 }
  0xd8   :  { %v121_v18 = vadd.f32 %v406_v12, %v369_v14 }
  0xd9   :  { %v112_v13 = vpop.f32.mrf.mxu0 }
  0xda   :  { %v113_v16 = vadd.f32 %v369_v14, %v112_v13  ;;  %v129_v24 = vmax.f32 %v121_v18, 0.0 }
  0xdb   :  { %v407_v15 = vpop.f32.mrf.mxu0 }
  0xdc   :  { %v124_v17 = vadd.f32 %v407_v15, %v369_v14  ;;  %v127_v22 = vmax.f32 %v113_v16, 0.0 }
  0xdd   :  { %v115_v19 = vpop.f32.mrf.mxu0 }
  0xde   :  { %v116_v20 = vadd.f32 %v369_v14, %v115_v19  ;;  %v130_v21 = vmax.f32 %v124_v17, 0.0 }
  0xe0   :  { %v128_v23 = vmax.f32 %v116_v20, 0.0  ;;  %v132_v26 = vpack.c.bf16 %v130_v21, %v129_v24 }
  0xe2   :  { %v131_v25 = vpack.c.bf16 %v128_v23, %v127_v22 }
  0xe4   :  { %416 = vmatprep.mubr.msk.bf16.mxu1 %vm172_vm1, %v131_v25 }
  0xe5   :  { %417 = vmatmul.mubr.msk.bf16.vlgmr.msra.gmra.mxu1 %vm172_vm1, %v132_v26 }
 0x1a5   :  { %v418_v29 = vpop.f32.mrf.mxu1 }
 0x1a6   :  { %v222_v35 = vadd.f32 %v418_v29, %v374_v31 }
 0x1a7   :  { %v213_v30 = vpop.f32.mrf.mxu1 }
 0x1a8   :  { %v214_v33 = vadd.f32 %v374_v31, %v213_v30  ;;  %v230_v41 = vmax.f32 %v222_v35, 0.0 }
 0x1a9   :  { %v419_v32 = vpop.f32.mrf.mxu1 }
 0x1aa   :  { %v225_v34 = vadd.f32 %v419_v32, %v374_v31  ;;  %v228_v39 = vmax.f32 %v214_v33, 0.0 }
 0x1ab   :  { %v216_v36 = vpop.f32.mrf.mxu1 }
 0x1ac   :  { %v217_v37 = vadd.f32 %v374_v31, %v216_v36  ;;  %v231_v38 = vmax.f32 %v225_v34, 0.0 }
 0x1ae   :  { %v229_v40 = vmax.f32 %v217_v37, 0.0  ;;  %v233_v43 = vpack.c.bf16 %v231_v38, %v230_v41 }
 0x1b0   :  { %v232_v42 = vpack.c.bf16 %v229_v40, %v228_v39 }
 0x1b2   :  { %424 = vmatprep.mubr.msk.bf16.mxu0 %vm71_vm0, %v232_v42 }
 0x1b3   :  { %425 = vmatmul.mubr.msk.bf16.vlgmr.msra.gmra.mxu0 %vm71_vm0, %v233_v43 }
 0x273   :  { %v426_v45 = vpop.f32.mrf.mxu0 }
 0x274   :  { %v306_v46 = vadd.f32 %v426_v45, %v381_v44 }
 0x275   :  { %v297_v47 = vpop.f32.mrf.mxu0 }
 0x276   :  { %v298_v48 = vadd.f32 %v381_v44, %v297_v47  ;;  %316 = vmax.xlane.f32.xlu1 %v306_v46 }
 0x277   :  { %v427_v49 = vpop.f32.mrf.mxu0 }
 0x278   :  { %v309_v50 = vadd.f32 %v427_v49, %v381_v44  ;;  %312 = vmax.xlane.f32.xlu0 %v298_v48 }
 0x279   :  { %v300_v51 = vpop.f32.mrf.mxu0 }
 0x27a   :  { %v301_v52 = vadd.f32 %v381_v44, %v300_v51  ;;  %318 = vmax.xlane.f32.xlu1 %v309_v50 }
 0x27c   :  { %314 = vmax.xlane.f32.xlu0 %v301_v52 }
 0x2ff   :  { %v317_v53 = vpop.xlane.xlu1 %316 }
 0x300   :  { %v322_v54 = vsub.f32 %v306_v46, %v317_v53 }
 0x301   :  { %v313_v55 = vpop.xlane.xlu0 %312 }
 0x302   :  { %v320_v56 = vsub.f32 %v298_v48, %v313_v55  ;;  %v328_v59 = vmul.f32 1.442695, %v322_v54 }
 0x303   :  { %v319_v57 = vpop.xlane.xlu1 %318 }
 0x304   :  { %v324_v58 = vmul.f32 1.442695, %v320_v56  ;;  %v323_v61 = vsub.f32 %v309_v50, %v319_v57 }
 0x305   :  { %v315_v60 = vpop.xlane.xlu0 %314 }
 0x306   :  { %442 = vpow2.f32 %v324_v58  ;;  %v321_v62 = vsub.f32 %v301_v52, %v315_v60  ;;  %v330_v0 = vmul.f32 1.442695, %v323_v61 }
 0x307   :  { %444 = vpow2.f32 %v328_v59 }
 0x308   :  { %v326_v63 = vmul.f32 1.442695, %v321_v62 }
 0x30a   :  { %446 = vpow2.f32 %v326_v63 }
 0x30b   :  { %448 = vpow2.f32 %v330_v0 }
 0x313   :  { %v443_v1 = vpop.eup %442 }
 0x314   :  { %332 = vadd.xlane.f32.xlu0 %v443_v1  ;;  %v445_v2 = vpop.eup %444 }
 0x317   :  { %v447_v3 = vpop.eup %446 }
 0x318   :  { %336 = vadd.xlane.f32.xlu0 %v445_v2  ;;  %334 = vadd.xlane.f32.xlu1 %v447_v3  ;;  %v449_v4 = vpop.eup %448 }
 0x31c   :  { %338 = vadd.xlane.f32.xlu1 %v449_v4 }
 0x39d   :  { %v333_v5 = vpop.xlane.xlu0 %332 }
 0x39e   :  { %450 = vrcp.f32 %v333_v5 }
 0x3a1   :  { %v335_v6 = vpop.xlane.xlu1 %334  ;;  %v337_v7 = vpop.xlane.xlu0 %336 }
 0x3a2   :  { %452 = vrcp.f32 %v335_v6 }
 0x3a3   :  { %454 = vrcp.f32 %v337_v7 }
 0x3a5   :  { %v339_v8 = vpop.xlane.xlu1 %338 }
 0x3a6   :  { %456 = vrcp.f32 %v339_v8 }
 0x3ab   :  { %v451_v9 = vpop.eup %450 }
 0x3ac   :  { %v341_v10 = vmul.f32 %v451_v9, %v443_v1 }
 0x3ae   :  { %348 = vst [vmem:[#allocation5] sm:$0xff] %v341_v10 }
 0x3af   :  { %v453_v11 = vpop.eup %452 }
 0x3b0   :  { %v455_v12 = vpop.eup %454  ;;  %v343_v13 = vmul.f32 %v453_v11, %v447_v3 }
 0x3b1   :  { %v345_v14 = vmul.f32 %v455_v12, %v445_v2 }
 0x3b2   :  { %349 = vst [vmem:[#allocation5 + $0x8] sm:$0xff] %v343_v13 }
 0x3b3   :  { %v457_v15 = vpop.eup %456  ;;  %350 = vst [vmem:[#allocation5 + $0x10] sm:$0xff] %v345_v14 }
 0x3b4   :  { %v347_v16 = vmul.f32 %v457_v15, %v449_v4 }
 0x3b6   :  { %351 = vst [vmem:[#allocation5 + $0x18] sm:$0xff] %v347_v16 }
 0x3b7   :  { %489 = shalt.err (!%p486_p9)
}
 0x3b8   :  { %s506_s30 = smov 128   ;;  %s507_s8 = smov 8  }
 0x3b9   :  { %363 = dma.vmem_to_hbm [thread:$0]  %s358_s6, 512, %s604_s7, [#allocation4], %s506_s30, %s506_s30, %s507_s8  }
 0x3ba   :  { %500 = dma.done.wait [#allocation4], 512  }
 0x3bb   :  { %501 = vsyncadd [#allocation4], 4294966784 }
 0x3bc   :  { %367 = vsyncpa [#allocation3], 1 }
 0x3bd   :  { %368 = vsyncpa [#allocation4], 1 }

</bundles_post_ra>
